<compile_context>
chip_gen: v7x
topology: tpu7x:2x2x1
jax: 0.10.0
libtpu: 0.0.40
codegen_flags: <defaults>
</compile_context>

<pallas_src>
import functools

import jax
import jax.numpy as jnp
from jax.experimental import pallas as pl
from jax.experimental.pallas import tpu as pltpu

_LANE = 128


def _round_up(x, m):
    return (x + m - 1) // m * m


def _sublane_multiple(dtype):
    # Sub-32-bit dtypes pack along sublanes: f32 -> 8, bf16 -> 16, int8/fp8 -> 32.
    return {4: 8, 2: 16, 1: 32}.get(jnp.dtype(dtype).itemsize, 8)


def _target_block_bytes():
    """Per-generation input-block budget (double-buffered by the pipeline)."""
    try:
        kind = jax.devices()[0].device_kind.lower()
    except Exception:  # pragma: no cover - non-TPU / query failure
        kind = ""
    # v5e: 16 MiB default scoped-VMEM limit and a single vst slot -> stay at <=6 MiB.
    if ("v5 lite" in kind) or ("v5e" in kind) or ("v5lite" in kind):
        return 6 * 1024 * 1024
    # v6e / v7x: bigger blocks amortize the ~0.35 us per-grid-step overhead.
    return 8 * 1024 * 1024


def _pool_kernel(x_ref, out_ref, *, inv_hw):
    """Single-pass path.  x_ref: (TB, H*W).  out_ref: (2, TB) = [max row ; avg row]."""
    x = x_ref[...]                                        # input dtype, no block-wide upcast
    mx = jnp.max(x, axis=1)                               # (TB,) exact in input dtype
    sm = jnp.sum(x.astype(jnp.float32), axis=1)           # (TB,) f32 accumulation
    out_ref[0, :] = mx.astype(out_ref.dtype)              # lane-dense stores
    out_ref[1, :] = (sm * inv_hw).astype(out_ref.dtype)


def _pool_split_kernel(x_ref, out_ref, m_ref, s_ref, *, inv_hw, hw, thw, needs_mask):
    """H*W-split path.  Grid (row_blocks, hw_blocks); hw axis is the reduction ("arbitrary").

    x_ref: (TB, THW) chunk.  out_ref: (2, TB).  m_ref / s_ref: (TB, 1) f32 scratch.
    """
    j = pl.program_id(1)

    @pl.when(j == 0)
    def _init():
        m_ref[...] = jnp.full(m_ref.shape, -jnp.inf, dtype=m_ref.dtype)
        s_ref[...] = jnp.zeros(s_ref.shape, dtype=s_ref.dtype)

    x = x_ref[...]
    if needs_mask:
        # Last chunk extends past H*W (grid padding on the reduction axis) -> mask it.
        col = jax.lax.broadcasted_iota(jnp.int32, x.shape, 1)
        valid = (j * thw + col) < hw
        x_max = jnp.where(valid, x, jnp.asarray(-jnp.inf, dtype=x.dtype))
        x_sum = jnp.where(valid, x, jnp.zeros((), dtype=x.dtype))
    else:
        x_max = x
        x_sum = x

    m_ref[...] = jnp.maximum(
        m_ref[...], jnp.max(x_max, axis=1, keepdims=True).astype(jnp.float32))
    s_ref[...] = s_ref[...] + jnp.sum(
        x_sum.astype(jnp.float32), axis=1, keepdims=True)

    @pl.when(j == pl.num_programs(1) - 1)
    def _finalize():
        mx = m_ref[...]                                   # (TB, 1)
        sm = s_ref[...]
        out_ref[0, :] = mx[:, 0].astype(out_ref.dtype)
        out_ref[1, :] = (sm[:, 0] * inv_hw).astype(out_ref.dtype)


def adaptive_concat_pool2d_pallas(x, *, target_block_bytes=None):
    """x: (N, C, H, W) float.  Returns (N, 2*C, 1, 1): [max-pool ‖ avg-pool] channels."""
    N, C, H, W = x.shape
    rows, hw = N * C, H * W
    dtype = x.dtype
    itemsize = jnp.dtype(dtype).itemsize
    sub = _sublane_multiple(dtype)
    hw_padded = _round_up(hw, _LANE)                      # real VMEM lanes per row
    bytes_per_row = hw_padded * itemsize
    target = target_block_bytes or _target_block_bytes()
    inv_hw = 1.0 / hw                                     # trace-time constant scale

    x2 = x.reshape(rows, hw)                              # reduction axis lane-dense

    # ---------------------------- block sizing -------------------------------
    split_hw = False
    thw = hw
    if rows * bytes_per_row <= target:
        # Whole (rows, hw) fits; still use >=2 row blocks when possible (v7x megacore).
        tb = _round_up(pl.cdiv(rows, 2), _LANE) if rows >= 2 * _LANE else rows
    elif _LANE * bytes_per_row <= target:
        # Multiple row blocks at full H*W; TB must be a multiple of 128 (lane-dense out).
        tb = max(_LANE, (target // bytes_per_row) // _LANE * _LANE)
    else:
        # Even 128 rows at full H*W overflow the budget -> also split the H*W axis.
        split_hw = True
        if rows <= 2 * _LANE:
            tb = rows
        else:
            tb = min(512, _round_up(pl.cdiv(rows, 2), _LANE))
        thw = max(_LANE, (target // (_round_up(tb, sub) * itemsize)) // _LANE * _LANE)
        thw = min(thw, hw_padded)
        if thw >= hw:                                     # degenerate: chunk covers all of H*W
            split_hw = False
            thw = hw

    num_row_blocks = pl.cdiv(rows, tb)
    out_cols = num_row_blocks * tb
    out_shape = jax.ShapeDtypeStruct((2, out_cols), dtype)

    # Padded VMEM footprint (double-buffered inputs/outputs + scratch) with headroom.
    in_block_bytes = _round_up(tb, sub) * (thw if split_hw else hw_padded) * itemsize
    out_block_bytes = 8 * _round_up(tb, _LANE) * 4
    scratch_bytes = (2 * _round_up(tb, 8) * _LANE * 4) if split_hw else 0
    needed = 2 * in_block_bytes + 2 * out_block_bytes + scratch_bytes
    vmem_limit = int(min(32 * 1024 * 1024, max(16 * 1024 * 1024, 2 * needed)))

    cost = pl.CostEstimate(
        flops=2 * rows * hw,
        transcendentals=0,
        bytes_accessed=rows * hw * itemsize + 2 * rows * itemsize,
    )

    if not split_hw:
        out2 = pl.pallas_call(
            functools.partial(_pool_kernel, inv_hw=inv_hw),
            out_shape=out_shape,
            grid=(num_row_blocks,),
            in_specs=[pl.BlockSpec((tb, hw), lambda i: (i, 0))],
            out_specs=pl.BlockSpec((2, tb), lambda i: (0, i)),
            compiler_params=pltpu.CompilerParams(
                dimension_semantics=("parallel",),
                vmem_limit_bytes=vmem_limit),
            cost_estimate=cost,
        )(x2)
    else:
        num_hw_blocks = pl.cdiv(hw, thw)
        out2 = pl.pallas_call(
            functools.partial(_pool_split_kernel, inv_hw=inv_hw, hw=hw, thw=thw,
                              needs_mask=(hw % thw != 0)),
            out_shape=out_shape,
            grid=(num_row_blocks, num_hw_blocks),
            in_specs=[pl.BlockSpec((tb, thw), lambda i, j: (i, j))],
            out_specs=pl.BlockSpec((2, tb), lambda i, j: (0, i)),
            scratch_shapes=[pltpu.VMEM((tb, 1), jnp.float32),
                            pltpu.VMEM((tb, 1), jnp.float32)],
            compiler_params=pltpu.CompilerParams(
                dimension_semantics=("parallel", "arbitrary"),
                vmem_limit_bytes=vmem_limit),
            cost_estimate=cost,
        )(x2)

    out2 = out2[:, :rows]                                 # drop row-block padding columns
    # (2, N*C) -> (N, 2*C, 1, 1): max channels first, then avg channels (torch.cat order).
    return out2.reshape(2, N, C).transpose(1, 0, 2).reshape(N, 2 * C, 1, 1)


def _reference(x):
    return jnp.concatenate(
        [jnp.max(x, axis=(2, 3), keepdims=True),
         jnp.mean(x, axis=(2, 3), keepdims=True)],
        axis=1)


if __name__ == "__main__":
    key = jax.random.PRNGKey(0)

    # Main check: small NCHW input consistent with the module's forward (single-pass path).
    x = jax.random.normal(key, (2, 4, 16, 16), dtype=jnp.float32)
    out = adaptive_concat_pool2d_pallas(x)
    jax.block_until_ready(out)
    ref = _reference(x)
    assert out.shape == (2, 8, 1, 1), out.shape
    assert jnp.allclose(out, ref, atol=1e-5, rtol=1e-5), float(jnp.max(jnp.abs(out - ref)))

    # Exercise the H*W-split accumulator path (forced tiny block budget), no tail mask.
    out_split = adaptive_concat_pool2d_pallas(x, target_block_bytes=4096)
    jax.block_until_ready(out_split)
    assert jnp.allclose(out_split, ref, atol=1e-5, rtol=1e-5), \
        float(jnp.max(jnp.abs(out_split - ref)))

    # Exercise the H*W-split path with a padded tail chunk (H*W not a multiple of 128).
    x2 = jax.random.normal(jax.random.PRNGKey(1), (2, 4, 16, 12), dtype=jnp.float32)
    out_mask = adaptive_concat_pool2d_pallas(x2, target_block_bytes=4096)
    jax.block_until_ready(out_mask)
    ref2 = _reference(x2)
    assert out_mask.shape == (2, 8, 1, 1), out_mask.shape
    assert jnp.allclose(out_mask, ref2, atol=1e-5, rtol=1e-5), \
        float(jnp.max(jnp.abs(out_mask - ref2)))

    print("KERNEL_OK")
</pallas_src>

<mosaic_0001>
module attributes {stable_mosaic.version = 11 : i64} {
  func.func @_pool_kernel(%arg0: i32, %arg1: memref<8x256xf32, #tpu.memory_space<vmem>>, %arg2: memref<2x8xf32, #tpu.memory_space<vmem>>) attributes {dimension_semantics = [#tpu.dimension_semantics<parallel>], iteration_bounds = array<i64: 1>, scalar_prefetch = 0 : i64, scratch_operands = 0 : i64, tpu.core_type = #tpu.core_type<tc>, window_params = [{transform_indices = @transform_0, window_bounds = array<i64: 8, 256>}, {transform_indices = @transform_1, window_bounds = array<i64: 2, 8>}]} {
    %c0 = arith.constant 0 : index
    %c0_0 = arith.constant 0 : index
    %0 = vector.load %arg1[%c0, %c0_0] : memref<8x256xf32, #tpu.memory_space<vmem>>, vector<8x256xf32>
    %cst = arith.constant dense<0xFF800000> : vector<8xf32>
    %1 = vector.multi_reduction <maximumf>, %0, %cst [1] : vector<8x256xf32> to vector<8xf32>
    %cst_1 = arith.constant dense<0.000000e+00> : vector<8xf32>
    %2 = vector.multi_reduction <add>, %0, %cst_1 [1] : vector<8x256xf32> to vector<8xf32>
    %c0_2 = arith.constant 0 : index
    %c0_3 = arith.constant 0 : index
    %3 = vector.load %arg2[%c0_2, %c0_3] : memref<2x8xf32, #tpu.memory_space<vmem>>, vector<1x8xf32>
    %4 = vector.shape_cast %3 : vector<1x8xf32> to vector<8xf32>
    %5 = vector.shape_cast %1 : vector<8xf32> to vector<1x8xf32>
    tpu.vector_store %arg2[%c0_2, %c0_3], %5 {strides = array<i32>} : memref<2x8xf32, #tpu.memory_space<vmem>>, vector<1x8xf32>,
    %cst_4 = arith.constant 3.906250e-03 : f32
    %6 = vector.broadcast %cst_4 : f32 to vector<8xf32>
    %7 = arith.mulf %2, %6 : vector<8xf32>
    %c1 = arith.constant 1 : index
    %c0_5 = arith.constant 0 : index
    %8 = vector.load %arg2[%c1, %c0_5] : memref<2x8xf32, #tpu.memory_space<vmem>>, vector<1x8xf32>
    %9 = vector.shape_cast %8 : vector<1x8xf32> to vector<8xf32>
    %10 = vector.shape_cast %7 : vector<8xf32> to vector<1x8xf32>
    tpu.vector_store %arg2[%c1, %c0_5], %10 {strides = array<i32>} : memref<2x8xf32, #tpu.memory_space<vmem>>, vector<1x8xf32>,
    return
  }
  func.func @transform_0(%arg0: i32) -> (i32, i32) {
    %c0_i32 = arith.constant 0 : i32
    %c0_i32_0 = arith.constant 0 : i32
    return %arg0, %c0_i32 : i32, i32
  }
  func.func @transform_1(%arg0: i32) -> (i32, i32) {
    %c0_i32 = arith.constant 0 : i32
    %c0_i32_0 = arith.constant 0 : i32
    return %c0_i32, %arg0 : i32, i32
  }
}

</mosaic_0001>

<bundles_post_ra>
// kernel: tpu_custom_call.1
= control target key start
LH: loop header
LB: loop body
LE: loop exit
PB: predicated region body
PF: predicated region fallthrough
CT: control target
= control target key end

     0   :  { %6 = vsyncpa [#allocation3], 0  ;;  %s148_s0 = inlined_call_operand.hbm [shape: f32[8,256], index: 0, kind: input, shape index: {}]   ;;  %s149_s1 = inlined_call_operand.hbm [shape: f32[2,8], index: 1, kind: output, shape index: {}]  }
   0x1   :  { %7 = vsyncpa [#allocation4], 0  ;;  %s112_s6 = smov [#allocation2]   ;;  %s64_s10 = scalar_lea.hbm %s148_s0, 256 }
   0x2   :  { %s14_s7 = sshll.u32 %s112_s6, 4  ;;  %p65_p0 = scmp.ne.s32.totalorder %s148_s0, %s64_s10  ;;  %s15_s7 = int_to_ptr.vmem [resolvable:$true] %s14_s7 }
   0x3   :  { %p68_p1 = scmp.lt.u32.totalorder %s64_s10, %s148_s0 }
   0x5   :  { %p70_p2 = pnand %p68_p1, %p65_p0 }
   0x7   :  { %73 = shalt.err (!%p70_p2)
}
   0x8   :  { %s74_s15 = scalar_lea.vmem %s15_s7, 256  ;;  %p79_p4 = scmp.lt.s32.totalorder %s15_s7, %s15_s7 }
   0x9   :  { %p75_p3 = scmp.ne.s32.totalorder %s15_s7, %s74_s15  ;;  %p80_p5 = scmp.lt.s32.totalorder %s74_s15, %s74_s15 }
   0xb   :  { %p81_p6 = por %p80_p5, %p79_p4 }
   0xd   :  { %p82_p7 = pnand %p81_p6, %p75_p3 }
   0xf   :  { %85 = shalt.err (!%p82_p7)
}
  0x10   :  { %17 = dma.hbm_to_vmem [thread:$0]  %s148_s0, 256, %s15_s7, [#allocation3]  }
  0x11   :  { %108 = dma.done.wait [#allocation3], 256  }
  0x12   :  { %109 = vsyncadd [#allocation3], 4294967040  ;;  %v21_v0 = vld [vmem:[#allocation2] sm:$0xff]  ;;  %v22_v1 = vld [vmem:[#allocation2 + $0x8] sm:$0xff]  ;;  %v30_v4 = vlaneseq  ;;  %vm37_vm0 = vcmask 57344   ;;  %s113_s18 = smov [#allocation5]  }
  0x13   :  { %v26_v2 = vadd.f32 %v22_v1, %v21_v0  ;;  %v23_v3 = vmax.f32 %v21_v0, %v22_v1  ;;  %s53_s19 = sshll.u32 %s113_s18, 4  ;;  %s54_s19 = int_to_ptr.vmem [resolvable:$true] %s53_s19 }
  0x14   :  { %v31_v5 = vand.u32 127, %v30_v4  ;;  %v33_v6 = vshrl.u32 %v30_v4, 7  ;;  %s86_s0 = scalar_lea.vmem %s54_s19, 32  ;;  %p91_p9 = scmp.lt.s32.totalorder %s54_s19, %s54_s19 }
  0x15   :  { %27 = vadd.xlane.f32.xlu0 %v26_v2  ;;  %p87_p8 = scmp.ne.s32.totalorder %s54_s19, %s86_s0  ;;  %p92_p10 = scmp.lt.s32.totalorder %s86_s0, %s86_s0 }
  0x16   :  { %v34_v7 = vsub.s32 %v31_v5, %v33_v6 }
  0x17   :  { %p93_p11 = por %p92_p10, %p91_p9 }
  0x19   :  { %24 = vmax.xlane.f32.xlu0 %v23_v3  ;;  %p94_p12 = pnand %p93_p11, %p87_p8 }
  0xa2   :  { %v28_v8 = vpop.xlane.xlu0 %27 }
  0xa3   :  { %v39_v9 = vmul.f32 0.00390625, %v28_v8 }
  0xa5   :  { %v44_v10 = vrot.slane %v39_v9, %v34_v7 }
  0xa6   :  { %v25_v11 = vpop.xlane.xlu0 %24 }
  0xa7   :  { %v35_v12 = vrot.slane %v25_v11, %v34_v7  ;;  %46 = vst.msk [vmem:[#allocation5 + $0x1] sm:$0x1] %vm37_vm0, %v44_v10 }
  0xa9   :  { %38 = vst.msk [vmem:[#allocation5] sm:$0x1] %vm37_vm0, %v35_v12 }
  0xaa   :  { %97 = shalt.err (!%p94_p12)
}
  0xab   :  { %s98_s22 = scalar_lea.hbm %s149_s1, 32 }
  0xac   :  { %p99_p13 = scmp.ne.s32.totalorder %s149_s1, %s98_s22  ;;  %p102_p0 = scmp.lt.u32.totalorder %s98_s22, %s149_s1 }
  0xae   :  { %p104_p1 = pnand %p102_p0, %p99_p13 }
  0xb0   :  { %107 = shalt.err (!%p104_p1)
}
  0xb1   :  { %56 = dma.vmem_to_hbm [thread:$0]  %s54_s19, 32, %s149_s1, [#allocation4]  }
  0xb2   :  { %110 = dma.done.wait [#allocation4], 32  }
  0xb3   :  { %111 = vsyncadd [#allocation4], 4294967264 }
  0xb4   :  { %60 = vsyncpa [#allocation3], 1 }
  0xb5   :  { %61 = vsyncpa [#allocation4], 1 }

</bundles_post_ra>
